<compile_context>
chip_gen: v7x
topology: tpu7x:2x2x1
jax: 0.10.0
libtpu: 0.0.40
codegen_flags: <defaults>
</compile_context>

<pallas_src>
import jax
import jax.numpy as jnp
from jax import lax
from jax.experimental import pallas as pl
from jax.experimental.pallas import tpu as pltpu


def _bag_counts(ids, vocab):
    """ids: [TB, S] int32 -> counts [TB, vocab] f32 (sum of one-hots over the bag)."""
    TB, S = ids.shape
    iota_v = lax.broadcasted_iota(jnp.int32, (TB, vocab), 1)
    counts = jnp.zeros((TB, vocab), jnp.float32)
    for s in range(S):  # S is small & static; unrolled VPU compares + adds
        counts = counts + (ids[:, s:s + 1] == iota_v).astype(jnp.float32)
    return counts


def _stats_kernel(x_ref, fw_ref, b1_ref, sum_ref, sumsq_ref):
    """Pass 1: h = counts @ fused_w + b1; accumulate batch sum / sum-of-squares."""
    @pl.when(pl.program_id(0) == 0)
    def _():
        sum_ref[...] = jnp.zeros_like(sum_ref)
        sumsq_ref[...] = jnp.zeros_like(sumsq_ref)

    counts = _bag_counts(x_ref[...], fw_ref.shape[0]).astype(fw_ref.dtype)
    h = jnp.dot(counts, fw_ref[...], preferred_element_type=jnp.float32) + b1_ref[...]
    sum_ref[...] += jnp.sum(h, axis=0, keepdims=True)
    sumsq_ref[...] += jnp.sum(h * h, axis=0, keepdims=True)


def _fwd_kernel(x_ref, fw_ref, b1_ref, scale_ref, shift_ref, w2_ref, b2_ref, o_ref):
    """Pass 2: h -> BN folded to one FMA -> ReLU -> lane-padded fc2."""
    counts = _bag_counts(x_ref[...], fw_ref.shape[0]).astype(fw_ref.dtype)
    h = jnp.dot(counts, fw_ref[...], preferred_element_type=jnp.float32) + b1_ref[...]
    h = h * scale_ref[...] + shift_ref[...]          # BatchNorm as a single FMA
    h = jnp.maximum(h, 0.0)                          # ReLU
    out = jnp.dot(h, w2_ref[...], preferred_element_type=jnp.float32) + b2_ref[...]
    o_ref[...] = out.astype(o_ref.dtype)


def _pick_batch_tile(B):
    # Largest 8-aligned tile dividing B, capped at 512 rows.  Per-tile VMEM here is
    # tiny (few hundred KiB double-buffered), well under v7x's 32 MiB scoped budget.
    for tb in (512, 256, 128, 64, 32, 16, 8):
        if B % tb == 0:
            return tb
    return B  # B not a multiple of 8 -> single full-batch block


def dense_network_forward(x_idx, emb_table, w1, b1, gamma, beta, w2, b2,
                          *, eps=1e-5, use_bf16_matmul=False):
    """x_idx: [B, S] int32 bag indices. Returns [B, 4] float32."""
    B, S = x_idx.shape
    V, D = emb_table.shape
    C1 = w1.shape[1]   # 32
    C2 = w2.shape[1]   # 4

    # Algebraic fold: (sum_s emb[idx_s]) @ w1 == counts @ (emb_table @ w1)
    fused_w = jnp.dot(emb_table.astype(jnp.float32), w1.astype(jnp.float32))  # [V, C1]
    if use_bf16_matmul:
        # v6e/v7x MXU bf16 fast path; counts are small integers (exact in bf16).
        fused_w = fused_w.astype(jnp.bfloat16)
    b1r = b1.reshape(1, C1).astype(jnp.float32)

    TB = _pick_batch_tile(B)
    nb = B // TB

    vmem_cap = 32 * 1024 * 1024
    cp_arb = pltpu.CompilerParams(dimension_semantics=("arbitrary",),
                                  vmem_limit_bytes=vmem_cap)
    cp_par = pltpu.CompilerParams(dimension_semantics=("parallel",),
                                  vmem_limit_bytes=vmem_cap)

    # ---- Pass 1: full-batch statistics for BatchNorm (training mode) ----
    sum_h, sumsq_h = pl.pallas_call(
        _stats_kernel,
        out_shape=(jax.ShapeDtypeStruct((1, C1), jnp.float32),
                   jax.ShapeDtypeStruct((1, C1), jnp.float32)),
        grid_spec=pltpu.PrefetchScalarGridSpec(
            num_scalar_prefetch=0,
            grid=(nb,),
            in_specs=[
                pl.BlockSpec((TB, S), lambda i: (i, 0)),   # bag indices tile
                pl.BlockSpec((V, C1), lambda i: (0, 0)),   # fused emb_table @ w1
                pl.BlockSpec((1, C1), lambda i: (0, 0)),   # b1
            ],
            out_specs=[pl.BlockSpec((1, C1), lambda i: (0, 0)),
                       pl.BlockSpec((1, C1), lambda i: (0, 0))]),
        compiler_params=cp_arb,
        cost_estimate=pl.CostEstimate(
            flops=2 * B * V * C1 + 4 * B * C1,
            transcendentals=0,
            bytes_accessed=B * S * 4 + V * C1 * 4 + 3 * C1 * 4),
    )(x_idx, fused_w, b1r)

    # Fold BN (batch mean, biased variance, eps=1e-5) into one scale/shift FMA.
    mean = sum_h / B
    var = sumsq_h / B - mean * mean
    scale = gamma.reshape(1, C1).astype(jnp.float32) * lax.rsqrt(var + eps)
    shift = beta.reshape(1, C1).astype(jnp.float32) - mean * scale

    # Lane-dense fc2: pad the 4 output features to 128 lanes (unmasked stores).
    NP = 128
    w2p = jnp.zeros((C1, NP), jnp.float32).at[:, :C2].set(w2.astype(jnp.float32))
    b2p = jnp.zeros((1, NP), jnp.float32).at[:, :C2].set(
        b2.reshape(1, C2).astype(jnp.float32))

    # ---- Pass 2: normalize + ReLU + fc2, batch-parallel ----
    out_pad = pl.pallas_call(
        _fwd_kernel,
        out_shape=jax.ShapeDtypeStruct((B, NP), jnp.float32),
        grid_spec=pltpu.PrefetchScalarGridSpec(
            num_scalar_prefetch=0,
            grid=(nb,),
            in_specs=[
                pl.BlockSpec((TB, S), lambda i: (i, 0)),   # bag indices tile
                pl.BlockSpec((V, C1), lambda i: (0, 0)),   # fused emb_table @ w1
                pl.BlockSpec((1, C1), lambda i: (0, 0)),   # b1
                pl.BlockSpec((1, C1), lambda i: (0, 0)),   # BN scale
                pl.BlockSpec((1, C1), lambda i: (0, 0)),   # BN shift
                pl.BlockSpec((C1, NP), lambda i: (0, 0)),  # padded w2
                pl.BlockSpec((1, NP), lambda i: (0, 0)),   # padded b2
            ],
            out_specs=pl.BlockSpec((TB, NP), lambda i: (i, 0))),
        compiler_params=cp_par,
        cost_estimate=pl.CostEstimate(
            flops=2 * B * (V * C1 + C1 * NP) + 4 * B * C1,
            transcendentals=0,
            bytes_accessed=B * S * 4 + V * C1 * 4
                           + (3 * C1 + C1 * NP + NP) * 4 + B * NP * 4),
    )(x_idx, fused_w, b1r, scale, shift, w2p, b2p)

    return out_pad[:, :C2]


if __name__ == "__main__":
    # Small, deterministic shapes consistent with the module:
    # vocab n=64, embedding dim=32, batch=8, bag (seq) length=8.
    n_vocab, dim = 64, 32
    B, S = 8, 8

    key = jax.random.PRNGKey(0)
    k_emb, k_w1, k_b1, k_w2, k_b2, k_x = jax.random.split(key, 6)

    # nn.EmbeddingBag default init: N(0, 1)
    emb_table = jax.random.normal(k_emb, (n_vocab, dim), dtype=jnp.float32)

    # nn.Linear(dim, 32): bound = 1/sqrt(fan_in)
    bound1 = 1.0 / jnp.sqrt(dim)
    w1 = jax.random.uniform(k_w1, (dim, 32), minval=-bound1, maxval=bound1,
                            dtype=jnp.float32)
    b1 = jax.random.uniform(k_b1, (1, 32), minval=-bound1, maxval=bound1,
                            dtype=jnp.float32)

    # BatchNorm1d(32): gamma=1, beta=0 (default init)
    gamma = jnp.ones((1, 32), dtype=jnp.float32)
    beta = jnp.zeros((1, 32), dtype=jnp.float32)

    # nn.Linear(32, 4)
    bound2 = 1.0 / jnp.sqrt(32.0)
    w2 = jax.random.uniform(k_w2, (32, 4), minval=-bound2, maxval=bound2,
                            dtype=jnp.float32)
    b2 = jax.random.uniform(k_b2, (1, 4), minval=-bound2, maxval=bound2,
                            dtype=jnp.float32)

    # Integer bag indices [B, S]
    x_idx = jax.random.randint(k_x, (B, S), minval=0, maxval=n_vocab,
                               dtype=jnp.int32)

    out = dense_network_forward(x_idx, emb_table, w1, b1, gamma, beta, w2, b2)
    out = jax.block_until_ready(out)

    # Pure-JAX reference of the original forward semantics
    ref_x = jnp.sum(emb_table[x_idx], axis=1)
    ref_h = ref_x @ w1 + b1
    ref_m = jnp.mean(ref_h, axis=0, keepdims=True)
    ref_v = jnp.mean((ref_h - ref_m) ** 2, axis=0, keepdims=True)
    ref_h = (ref_h - ref_m) / jnp.sqrt(ref_v + 1e-5) * gamma + beta
    ref_h = jnp.maximum(ref_h, 0.0)
    ref_o = ref_h @ w2 + b2

    assert out.shape == (B, 4)
    assert jnp.allclose(out, ref_o, atol=1e-4, rtol=1e-4), (
        f"max abs err {jnp.max(jnp.abs(out - ref_o))}")

    print("KERNEL_OK")
</pallas_src>

<mosaic_0001>
module attributes {stable_mosaic.version = 11 : i64} {
  func.func @_stats_kernel(%arg0: i32, %arg1: memref<8x8xi32, #tpu.memory_space<vmem>>, %arg2: memref<64x32xf32, #tpu.memory_space<vmem>>, %arg3: memref<1x32xf32, #tpu.memory_space<vmem>>, %arg4: memref<1x32xf32, #tpu.memory_space<vmem>>, %arg5: memref<1x32xf32, #tpu.memory_space<vmem>>) attributes {dimension_semantics = [#tpu.dimension_semantics<arbitrary>], iteration_bounds = array<i64: 1>, scalar_prefetch = 0 : i64, scratch_operands = 0 : i64, tpu.core_type = #tpu.core_type<tc>, window_params = [{transform_indices = @transform_0, window_bounds = array<i64: 8, 8>}, {pipeline_mode = #tpu.pipeline_mode<synchronous>, transform_indices = @transform_1, window_bounds = array<i64: 64, 32>}, {pipeline_mode = #tpu.pipeline_mode<synchronous>, transform_indices = @transform_2, window_bounds = array<i64: 1, 32>}, {pipeline_mode = #tpu.pipeline_mode<synchronous>, transform_indices = @transform_3, window_bounds = array<i64: 1, 32>}, {pipeline_mode = #tpu.pipeline_mode<synchronous>, transform_indices = @transform_4, window_bounds = array<i64: 1, 32>}]} {
    %c0_i32 = arith.constant 0 : i32
    %0 = arith.cmpi eq, %arg0, %c0_i32 : i32
    %1 = arith.extui %0 : i1 to i32
    %c0_i32_0 = arith.constant 0 : i32
    %2 = arith.cmpi ne, %1, %c0_i32_0 : i32
    scf.if %2 {
      %cst_17 = arith.constant 0.000000e+00 : f32
      %70 = vector.broadcast %cst_17 : f32 to vector<1x32xf32>
      %c0_18 = arith.constant 0 : index
      %c0_19 = arith.constant 0 : index
      %71 = vector.load %arg4[%c0_18, %c0_19] : memref<1x32xf32, #tpu.memory_space<vmem>>, vector<1x32xf32>
      tpu.vector_store %arg4[%c0_18, %c0_19], %70 {strides = array<i32>} : memref<1x32xf32, #tpu.memory_space<vmem>>, vector<1x32xf32>,
      %cst_20 = arith.constant 0.000000e+00 : f32
      %72 = vector.broadcast %cst_20 : f32 to vector<1x32xf32>
      %c0_21 = arith.constant 0 : index
      %c0_22 = arith.constant 0 : index
      %73 = vector.load %arg5[%c0_21, %c0_22] : memref<1x32xf32, #tpu.memory_space<vmem>>, vector<1x32xf32>
      tpu.vector_store %arg5[%c0_21, %c0_22], %72 {strides = array<i32>} : memref<1x32xf32, #tpu.memory_space<vmem>>, vector<1x32xf32>,
    } else {
    }
    %c0 = arith.constant 0 : index
    %c0_1 = arith.constant 0 : index
    %3 = vector.load %arg1[%c0, %c0_1] : memref<8x8xi32, #tpu.memory_space<vmem>>, vector<8x8xi32>
    %4 = tpu.iota {dimensions = array<i32: 1>} : vector<8x64xi32>
    %cst = arith.constant 0.000000e+00 : f32
    %5 = vector.broadcast %cst : f32 to vector<8x64xf32>
    %6 = vector.extract_strided_slice %3 {offsets = [0, 0], sizes = [8, 1], strides = [1, 1]} : vector<8x8xi32> to vector<8x1xi32>
    %7 = vector.broadcast %6 : vector<8x1xi32> to vector<8x64xi32>
    %8 = arith.cmpi eq, %7, %4 : vector<8x64xi32>
    %9 = arith.extui %8 : vector<8x64xi1> to vector<8x64xi32>
    %10 = arith.sitofp %9 : vector<8x64xi32> to vector<8x64xf32>
    %11 = arith.addf %5, %10 : vector<8x64xf32>
    %12 = vector.extract_strided_slice %3 {offsets = [0, 1], sizes = [8, 1], strides = [1, 1]} : vector<8x8xi32> to vector<8x1xi32>
    %13 = vector.broadcast %12 : vector<8x1xi32> to vector<8x64xi32>
    %14 = arith.cmpi eq, %13, %4 : vector<8x64xi32>
    %15 = arith.extui %14 : vector<8x64xi1> to vector<8x64xi32>
    %16 = arith.sitofp %15 : vector<8x64xi32> to vector<8x64xf32>
    %17 = arith.addf %11, %16 : vector<8x64xf32>
    %18 = vector.extract_strided_slice %3 {offsets = [0, 2], sizes = [8, 1], strides = [1, 1]} : vector<8x8xi32> to vector<8x1xi32>
    %19 = vector.broadcast %18 : vector<8x1xi32> to vector<8x64xi32>
    %20 = arith.cmpi eq, %19, %4 : vector<8x64xi32>
    %21 = arith.extui %20 : vector<8x64xi1> to vector<8x64xi32>
    %22 = arith.sitofp %21 : vector<8x64xi32> to vector<8x64xf32>
    %23 = arith.addf %17, %22 : vector<8x64xf32>
    %24 = vector.extract_strided_slice %3 {offsets = [0, 3], sizes = [8, 1], strides = [1, 1]} : vector<8x8xi32> to vector<8x1xi32>
    %25 = vector.broadcast %24 : vector<8x1xi32> to vector<8x64xi32>
    %26 = arith.cmpi eq, %25, %4 : vector<8x64xi32>
    %27 = arith.extui %26 : vector<8x64xi1> to vector<8x64xi32>
    %28 = arith.sitofp %27 : vector<8x64xi32> to vector<8x64xf32>
    %29 = arith.addf %23, %28 : vector<8x64xf32>
    %30 = vector.extract_strided_slice %3 {offsets = [0, 4], sizes = [8, 1], strides = [1, 1]} : vector<8x8xi32> to vector<8x1xi32>
    %31 = vector.broadcast %30 : vector<8x1xi32> to vector<8x64xi32>
    %32 = arith.cmpi eq, %31, %4 : vector<8x64xi32>
    %33 = arith.extui %32 : vector<8x64xi1> to vector<8x64xi32>
    %34 = arith.sitofp %33 : vector<8x64xi32> to vector<8x64xf32>
    %35 = arith.addf %29, %34 : vector<8x64xf32>
    %36 = vector.extract_strided_slice %3 {offsets = [0, 5], sizes = [8, 1], strides = [1, 1]} : vector<8x8xi32> to vector<8x1xi32>
    %37 = vector.broadcast %36 : vector<8x1xi32> to vector<8x64xi32>
    %38 = arith.cmpi eq, %37, %4 : vector<8x64xi32>
    %39 = arith.extui %38 : vector<8x64xi1> to vector<8x64xi32>
    %40 = arith.sitofp %39 : vector<8x64xi32> to vector<8x64xf32>
    %41 = arith.addf %35, %40 : vector<8x64xf32>
    %42 = vector.extract_strided_slice %3 {offsets = [0, 6], sizes = [8, 1], strides = [1, 1]} : vector<8x8xi32> to vector<8x1xi32>
    %43 = vector.broadcast %42 : vector<8x1xi32> to vector<8x64xi32>
    %44 = arith.cmpi eq, %43, %4 : vector<8x64xi32>
    %45 = arith.extui %44 : vector<8x64xi1> to vector<8x64xi32>
    %46 = arith.sitofp %45 : vector<8x64xi32> to vector<8x64xf32>
    %47 = arith.addf %41, %46 : vector<8x64xf32>
    %48 = vector.extract_strided_slice %3 {offsets = [0, 7], sizes = [8, 1], strides = [1, 1]} : vector<8x8xi32> to vector<8x1xi32>
    %49 = vector.broadcast %48 : vector<8x1xi32> to vector<8x64xi32>
    %50 = arith.cmpi eq, %49, %4 : vector<8x64xi32>
    %51 = arith.extui %50 : vector<8x64xi1> to vector<8x64xi32>
    %52 = arith.sitofp %51 : vector<8x64xi32> to vector<8x64xf32>
    %53 = arith.addf %47, %52 : vector<8x64xf32>
    %c0_2 = arith.constant 0 : index
    %c0_3 = arith.constant 0 : index
    %54 = vector.load %arg2[%c0_2, %c0_3] : memref<64x32xf32, #tpu.memory_space<vmem>>, vector<64x32xf32>
    %cst_4 = arith.constant dense<0.000000e+00> : vector<8x32xf32>
    %55 = tpu.matmul %53, %54, %cst_4 {dimension_numbers = #tpu.dot_dimension_numbers<[1], [0], [0], [1], [0, 0, 1, 1], [], []>} : vector<8x64xf32>, vector<64x32xf32>, vector<8x32xf32> -> vector<8x32xf32>
    %c0_5 = arith.constant 0 : index
    %c0_6 = arith.constant 0 : index
    %56 = vector.load %arg3[%c0_5, %c0_6] : memref<1x32xf32, #tpu.memory_space<vmem>>, vector<1x32xf32>
    %57 = vector.broadcast %56 : vector<1x32xf32> to vector<8x32xf32>
    %58 = arith.addf %55, %57 : vector<8x32xf32>
    %c0_7 = arith.constant 0 : index
    %c0_8 = arith.constant 0 : index
    %59 = vector.load %arg4[%c0_7, %c0_8] : memref<1x32xf32, #tpu.memory_space<vmem>>, vector<1x32xf32>
    %cst_9 = arith.constant dense<0.000000e+00> : vector<32xf32>
    %60 = vector.multi_reduction <add>, %58, %cst_9 [0] : vector<8x32xf32> to vector<32xf32>
    %61 = vector.shape_cast %60 : vector<32xf32> to vector<1x32xf32>
    %62 = arith.addf %59, %61 : vector<1x32xf32>
    %c0_10 = arith.constant 0 : index
    %c0_11 = arith.constant 0 : index
    %63 = vector.load %arg4[%c0_10, %c0_11] : memref<1x32xf32, #tpu.memory_space<vmem>>, vector<1x32xf32>
    tpu.vector_store %arg4[%c0_10, %c0_11], %62 {strides = array<i32>} : memref<1x32xf32, #tpu.memory_space<vmem>>, vector<1x32xf32>,
    %c0_12 = arith.constant 0 : index
    %c0_13 = arith.constant 0 : index
    %64 = vector.load %arg5[%c0_12, %c0_13] : memref<1x32xf32, #tpu.memory_space<vmem>>, vector<1x32xf32>
    %65 = arith.mulf %58, %58 : vector<8x32xf32>
    %cst_14 = arith.constant dense<0.000000e+00> : vector<32xf32>
    %66 = vector.multi_reduction <add>, %65, %cst_14 [0] : vector<8x32xf32> to vector<32xf32>
    %67 = vector.shape_cast %66 : vector<32xf32> to vector<1x32xf32>
    %68 = arith.addf %64, %67 : vector<1x32xf32>
    %c0_15 = arith.constant 0 : index
    %c0_16 = arith.constant 0 : index
    %69 = vector.load %arg5[%c0_15, %c0_16] : memref<1x32xf32, #tpu.memory_space<vmem>>, vector<1x32xf32>
    tpu.vector_store %arg5[%c0_15, %c0_16], %68 {strides = array<i32>} : memref<1x32xf32, #tpu.memory_space<vmem>>, vector<1x32xf32>,
    return
  }
  func.func @transform_0(%arg0: i32) -> (i32, i32) {
    %c0_i32 = arith.constant 0 : i32
    %c0_i32_0 = arith.constant 0 : i32
    return %arg0, %c0_i32 : i32, i32
  }
  func.func @transform_1(%arg0: i32) -> (i32, i32) {
    %c0_i32 = arith.constant 0 : i32
    %c0_i32_0 = arith.constant 0 : i32
    %c0_i32_1 = arith.constant 0 : i32
    return %c0_i32, %c0_i32_0 : i32, i32
  }
  func.func @transform_2(%arg0: i32) -> (i32, i32) {
    %c0_i32 = arith.constant 0 : i32
    %c0_i32_0 = arith.constant 0 : i32
    %c0_i32_1 = arith.constant 0 : i32
    return %c0_i32, %c0_i32_0 : i32, i32
  }
  func.func @transform_3(%arg0: i32) -> (i32, i32) {
    %c0_i32 = arith.constant 0 : i32
    %c0_i32_0 = arith.constant 0 : i32
    %c0_i32_1 = arith.constant 0 : i32
    return %c0_i32, %c0_i32_0 : i32, i32
  }
  func.func @transform_4(%arg0: i32) -> (i32, i32) {
    %c0_i32 = arith.constant 0 : i32
    %c0_i32_0 = arith.constant 0 : i32
    %c0_i32_1 = arith.constant 0 : i32
    return %c0_i32, %c0_i32_0 : i32, i32
  }
}

</mosaic_0001>

<bundles_post_ra>
// kernel: tpu_custom_call.1
= control target key start
LH: loop header
LB: loop body
LE: loop exit
PB: predicated region body
PF: predicated region fallthrough
CT: control target
= control target key end

     0   :  { %10 = vsyncpa [#allocation3], 0  ;;  %v344_v1 = vmov 2   ;;  %v345_v2 = vmov 0   ;;  %s448_s0 = inlined_call_operand.vmem [shape: s32[8,8], index: 0, kind: input, shape index: {}]   ;;  %s449_s1 = inlined_call_operand.vmem [shape: f32[64,32], index: 1, kind: input, shape index: {}]   ;;  %s450_s2 = inlined_call_operand.vmem [shape: f32[1,32], index: 2, kind: input, shape index: {}]   ;;  %s451_s3 = inlined_call_operand.hbm [shape: f32[1,32], index: 3, kind: output, shape index: {0}]   ;;  %s452_s4 = inlined_call_operand.hbm [shape: f32[1,32], index: 4, kind: output, shape index: {1}]  }
   0x1   :  { %v25_v0 = vld [vmem:[%s448_s0] sm:$0xff]  ;;  %289 = vset.pattern.permute.xlu1 %v344_v1  ;;  %287 = vset.pattern.permute.xlu0 %v345_v2 }
   0x2   :  { %11 = vsyncpa [#allocation5], 0  ;;  %43 = vperm.xlu1 %289, %v25_v0   ;;  %29 = vperm.xlu0 %287, %v25_v0   ;;  %v346_v3 = vmov 3   ;;  %v347_v4 = vmov 1   ;;  %v84_v5 = vld [vmem:[%s449_s1] sm:$0xff]  ;;  %v85_v6 = vld [vmem:[%s449_s1 + $0x8] sm:$0xff]  ;;  %v26_v23 = vlaneseq }
   0x3   :  { %v263_v7 = vpack.c.bf16 %v85_v6, %v84_v5  ;;  %v348_v8 = vmov 0.0|0.0   ;;  %v349_v9 = vmov 4   ;;  %v350_v10 = vmov 5   ;;  %v86_v11 = vld [vmem:[%s449_s1 + $0x10] sm:$0xff]  ;;  %v87_v12 = vld [vmem:[%s449_s1 + $0x18] sm:$0xff]  ;;  %v88_v15 = vld [vmem:[%s449_s1 + $0x20] sm:$0xff] }
   0x4   :  { %262 = vmatprep.subr.bf16.mxu0 %v348_v8  ;;  %v266_v13 = vpack.c.bf16 %v87_v12, %v86_v11  ;;  %v351_v14 = vmov 6   ;;  %v89_v16 = vld [vmem:[%s449_s1 + $0x28] sm:$0xff]  ;;  %v352_v17 = vmov 7   ;;  %v90_v19 = vld [vmem:[%s449_s1 + $0x30] sm:$0xff]  ;;  %v91_v20 = vld [vmem:[%s449_s1 + $0x38] sm:$0xff]  ;;  %vm353_vm0 = vmmov 0  }
   0x5   :  { %264 = vmatpush3.bf16.msra.mxu0 %v263_v7  ;;  %v269_v18 = vpack.c.bf16 %v89_v16, %v88_v15  ;;  %v272_v21 = vpack.c.bf16 %v91_v20, %v90_v19  ;;  %v354_v22 = vmov 0.0   ;;  %v27_v26 = vand.u32 127, %v26_v23  ;;  %v232_v48 = vld [vmem:[%s450_s2] ss:$0 sm:$0xff]  ;;  %s355_s7 = smov [#allocation2]   ;;  %s356_s2 = smov [#allocation4]  }
   0x6   :  { %290 = vset.pattern.permute.xlu1 %v346_v3  ;;  %288 = vset.pattern.permute.xlu0 %v347_v4  ;;  %vm99_vm9 = vcmask 523264   ;;  %vm22_vm10 = vcmask 253952   ;;  %vm174_vm11 = vcmask 261120   ;;  %s202_s8 = sshll.u32 %s355_s7, 4  ;;  %s212_s9 = sshll.u32 %s356_s2, 4  ;;  %s203_s8 = int_to_ptr.vmem [resolvable:$true] %s202_s8  ;;  %s415_s9 = int_to_ptr.vmem [resolvable:$true] %s212_s9 }
   0x7   :  { %50 = vperm.xlu1 %290, %v25_v0   ;;  %36 = vperm.xlu0 %288, %v25_v0   ;;  %23 = vst.msk [vmem:[#allocation2] sm:$0x1] %vm22_vm10, %v354_v22  ;;  %24 = vst.msk [vmem:[#allocation4] sm:$0x1] %vm22_vm10, %v354_v22  ;;  %s296_s10 = scalar_lea.vmem %s203_s8, 16  ;;  %s300_s11 = scalar_lea.vmem %s203_s8, 32 }
   0x8   :  { %265 = vmatprep.subr.bf16.mxu0 %v348_v8  ;;  %259 = vmatprep.mubr.msk.f32.mxu0 %vm353_vm0, %v354_v22  ;;  %p297_p0 = scmp.ne.s32.totalorder %s203_s8, %s296_s10  ;;  %p301_p1 = scmp.lt.s32.totalorder %s203_s8, %s203_s8 }
   0x9   :  { %267 = vmatpush3.bf16.msra.mxu0 %v266_v13  ;;  %p302_p2 = scmp.lt.s32.totalorder %s300_s11, %s296_s10 }
   0xa   :  { %268 = vmatprep.subr.bf16.mxu0 %v348_v8 }
   0xb   :  { %291 = vset.pattern.permute.xlu1 %v349_v9  ;;  %292 = vset.pattern.permute.xlu0 %v350_v10  ;;  %p303_p3 = por %p302_p2, %p301_p1 }
   0xc   :  { %57 = vperm.xlu1 %291, %v25_v0   ;;  %64 = vperm.xlu0 %292, %v25_v0  }
   0xd   :  { %270 = vmatpush3.bf16.msra.mxu0 %v269_v18  ;;  %p304_p4 = pnand %p303_p3, %p297_p0 }
   0xe   :  { %271 = vmatprep.subr.bf16.mxu0 %v348_v8  ;;  %v185_v3 = vld [vmem:[#allocation4] sm:$0x1] }
  0x10   :  { %293 = vset.pattern.permute.xlu1 %v351_v14  ;;  %295 = vset.pattern.permute.xlu0 %v352_v17 }
  0x11   :  { %71 = vperm.xlu1 %293, %v25_v0   ;;  %273 = vmatpush3.bf16.msra.mxu0 %v272_v21 }
  0x15   :  { %294 = vset.pattern.permute.xlu1 %v352_v17 }
  0x16   :  { %78 = vperm.xlu1 %294, %v25_v0   ;;  %v173_v0 = vld [vmem:[#allocation2] sm:$0x1] }
  0x81   :  { %v44_v24 = vpop.permute.xlu1 %43  ;;  %v30_v25 = vpop.permute.xlu0 %29 }
  0x82   :  { %vm31_vm1 = vcmp.eq.s32.totalorder %v30_v25, %v27_v26  ;;  %vm45_vm2 = vcmp.eq.s32.totalorder %v44_v24, %v27_v26 }
  0x83   :  { %v224_v29 = vsel %vm31_vm1, 1.0, %v354_v22  ;;  %v226_v32 = vsel %vm45_vm2, 1.0, %v354_v22 }
  0x86   :  { %v51_v27 = vpop.permute.xlu1 %50  ;;  %v37_v28 = vpop.permute.xlu0 %36 }
  0x87   :  { %vm38_vm3 = vcmp.eq.s32.totalorder %v37_v28, %v27_v26  ;;  %vm52_vm4 = vcmp.eq.s32.totalorder %v51_v27, %v27_v26 }
  0x88   :  { %v225_v30 = vsel %vm38_vm3, 1.0, %v354_v22  ;;  %v227_v36 = vsel %vm52_vm4, 1.0, %v354_v22 }
  0x89   :  { %v41_v31 = vadd.f32 %v225_v30, %v224_v29 }
  0x8b   :  { %v48_v33 = vadd.f32 %v226_v32, %v41_v31  ;;  %v58_v34 = vpop.permute.xlu1 %57  ;;  %v65_v35 = vpop.permute.xlu0 %64 }
  0x8c   :  { %vm59_vm5 = vcmp.eq.s32.totalorder %v58_v34, %v27_v26  ;;  %vm66_vm6 = vcmp.eq.s32.totalorder %v65_v35, %v27_v26 }
  0x8d   :  { %v55_v37 = vadd.f32 %v227_v36, %v48_v33  ;;  %v228_v38 = vsel %vm59_vm5, 1.0, %v354_v22  ;;  %v229_v40 = vsel %vm66_vm6, 1.0, %v354_v22 }
  0x8f   :  { %v62_v39 = vadd.f32 %v228_v38, %v55_v37 }
  0x90   :  { %v72_v41 = vpop.permute.xlu1 %71 }
  0x91   :  { %vm73_vm7 = vcmp.eq.s32.totalorder %v72_v41, %v27_v26  ;;  %v69_v42 = vadd.f32 %v229_v40, %v62_v39 }
  0x92   :  { %v230_v43 = vsel %vm73_vm7, 1.0, %v354_v22 }
  0x93   :  { %v76_v45 = vadd.f32 %v230_v43, %v69_v42 }
  0x95   :  { %v79_v44 = vpop.permute.xlu1 %78 }
  0x96   :  { %vm80_vm8 = vcmp.eq.s32.totalorder %v79_v44, %v27_v26 }
  0x97   :  { %v231_v46 = vsel %vm80_vm8, 1.0, %v354_v22 }
  0x98   :  { %v83_v47 = vadd.f32 %v231_v46, %v76_v45 }
  0x9a   :  { %260 = vmatmul.mubr.msk.f32.vlgmr.msra.gmra.mrb[0].mxu0 %vm99_vm9, %v83_v47 }
 0x16d   :  { %v169_v49 = vpop.f32.mrb[0].mxu0 }
 0x16e   :  { %v170_v50 = vadd.f32 %v232_v48, %v169_v49  ;;  %v261_v51 = vpop.f32.mrb[1].mxu0 }
 0x170   :  { %v175_v52 = vsel %vm174_vm11, %v170_v50, 0.0  ;;  %v186_v53 = vmul.f32 %v170_v50, %v170_v50 }
 0x171   :  { %v176_v54 = vrot.slane %v175_v52, 4 }
 0x172   :  { %v187_v55 = vsel %vm174_vm11, %v186_v53, 0.0 }
 0x173   :  { %v177_v56 = vadd.f32 %v176_v54, %v175_v52  ;;  %v188_v57 = vrot.slane %v187_v55, 4 }
 0x175   :  { %v178_v58 = vrot.slane %v177_v56, 2  ;;  %v189_v59 = vadd.f32 %v188_v57, %v187_v55 }
 0x177   :  { %v179_v60 = vadd.f32 %v178_v58, %v177_v56  ;;  %v190_v61 = vrot.slane %v189_v59, 2 }
 0x179   :  { %v180_v62 = vrot.slane %v179_v60, 1  ;;  %v191_v63 = vadd.f32 %v190_v61, %v189_v59 }
 0x17b   :  { %v192_v1 = vrot.slane %v191_v63, 1  ;;  %v181_v2 = vadd.f32 %v180_v62, %v179_v60 }
 0x17d   :  { %v182_v4 = vadd.f32 %v181_v2, %v173_v0  ;;  %v193_v5 = vadd.f32 %v192_v1, %v191_v63 }
 0x17f   :  { %184 = vst.msk [vmem:[#allocation2] sm:$0x1] %vm22_vm10, %v182_v4  ;;  %v194_v6 = vadd.f32 %v193_v5, %v185_v3 }
 0x180   :  { %307 = shalt.err (!%p304_p4)
}
 0x181   :  { %s308_s14 = scalar_lea.hbm %s451_s3, 16 }
 0x182   :  { %p309_p5 = scmp.ne.s32.totalorder %s451_s3, %s308_s14  ;;  %p312_p6 = scmp.lt.u32.totalorder %s308_s14, %s451_s3 }
 0x184   :  { %p314_p7 = pnand %p312_p6, %p309_p5 }
 0x186   :  { %317 = shalt.err (!%p314_p7)
}
 0x187   :  { %205 = dma.vmem_to_hbm [thread:$0]  %s203_s8, 16, %s451_s3, [#allocation3]   ;;  %195 = vst.msk [vmem:[#allocation4] sm:$0x1] %vm22_vm10, %v194_v6 }
 0x188   :  { %s318_s0 = scalar_lea.vmem %s415_s9, 16  ;;  %s322_s21 = scalar_lea.vmem %s415_s9, 32 }
 0x189   :  { %p319_p8 = scmp.ne.s32.totalorder %s415_s9, %s318_s0  ;;  %p323_p9 = scmp.lt.s32.totalorder %s415_s9, %s415_s9 }
 0x18a   :  { %p324_p10 = scmp.lt.s32.totalorder %s322_s21, %s318_s0 }
 0x18c   :  { %p325_p11 = por %p324_p10, %p323_p9 }
 0x18e   :  { %p326_p12 = pnand %p325_p11, %p319_p8 }
 0x190   :  { %329 = shalt.err (!%p326_p12)
}
 0x191   :  { %s330_s24 = scalar_lea.hbm %s452_s4, 16 }
 0x192   :  { %p331_p13 = scmp.ne.s32.totalorder %s452_s4, %s330_s24  ;;  %p334_p0 = scmp.lt.u32.totalorder %s330_s24, %s452_s4 }
 0x194   :  { %p336_p1 = pnand %p334_p0, %p331_p13 }
 0x196   :  { %339 = shalt.err (!%p336_p1)
}
 0x197   :  { %215 = dma.vmem_to_hbm [thread:$0]  %s415_s9, 16, %s452_s4, [#allocation5]  }
 0x198   :  { %340 = dma.done.wait [#allocation3], 16  }
 0x199   :  { %341 = vsyncadd [#allocation3], 4294967280 }
 0x19a   :  { %342 = dma.done.wait [#allocation5], 16  }
 0x19b   :  { %343 = vsyncadd [#allocation5], 4294967280 }
 0x19c   :  { %222 = vsyncpa [#allocation3], 1 }
 0x19d   :  { %223 = vsyncpa [#allocation5], 1 }

</bundles_post_ra>
